<compile_context>
chip_gen: v7x
topology: tpu7x:2x2x1
jax: 0.10.0
libtpu: 0.0.40
codegen_flags: <defaults>
</compile_context>

<pallas_src>
import functools
import math

import jax
import jax.numpy as jnp
import numpy as np
from jax.experimental import pallas as pl
from jax.experimental.pallas import tpu as pltpu

_LANES = 1024                            # lane-dense fallback width (8 f32 vregs / row)
_TARGET_BLOCK_BYTES = 4 * 1024 * 1024    # ~4 MiB block; 4x (dbl-buffered in+out) = 16 MiB
_MIN_BLOCK_BYTES = 512 * 1024            # don't shrink blocks below this to create steps
_MIN_GRID_STEPS = 4                      # >= 2 steps per TensorCore on v7x


def _uaq_kernel(x_ref, o_ref, *, delta: float, inv_delta: float,
                use_recip: bool, zero_point: float, qmax: float):
    """Elementwise uniform-affine fake-quantization on one VMEM tile."""
    x = x_ref[...].astype(jnp.float32)
    # round_ste forward semantics == plain round (ties-to-even, matches torch.round).
    scaled = x * inv_delta if use_recip else x / delta
    x_int = jnp.round(scaled) + zero_point
    x_quant = jnp.clip(x_int, 0.0, qmax)
    o_ref[...] = ((x_quant - zero_point) * delta).astype(o_ref.dtype)


def _choose_block_rows(rows: int, lanes: int, itemsize: int) -> int:
    """Pick a sublane-packed block row count for a (rows, lanes) slab."""
    sub = max(8, 32 // itemsize)                      # f32 -> 8, bf16 -> 16, int8 -> 32
    row_bytes = lanes * itemsize
    target_rows = max(sub, _TARGET_BLOCK_BYTES // row_bytes)
    min_rows = max(sub, _MIN_BLOCK_BYTES // row_bytes)
    per_step = -(-rows // _MIN_GRID_STEPS)            # aim for >= _MIN_GRID_STEPS steps
    block_rows = min(target_rows, max(per_step, min_rows))
    if block_rows >= rows:
        return rows                                   # single full-extent block (always legal)
    return max(sub, (block_rows // sub) * sub)        # multiple of the sublane packing


def uniform_affine_quantize(x: jax.Array,
                            delta: float = 1.0,
                            zero_point: float = 0.0,
                            n_bits: int = 8) -> jax.Array:
    """Pallas implementation of UniformAffineQuantizer.forward (inited=True path)."""
    assert 2 <= n_bits <= 8, "bitwidth not supported"
    n_levels = 2 ** n_bits

    orig_shape = x.shape
    orig_dtype = x.dtype
    itemsize = jnp.dtype(orig_dtype).itemsize
    total = int(np.prod(orig_shape)) if orig_shape else 1

    # Choose a lane-dense 2-D view with zero (or minimal) wrapper-side copies.
    if (len(orig_shape) >= 2 and orig_shape[-1] % 128 == 0
            and orig_shape[-1] * itemsize <= _TARGET_BLOCK_BYTES):
        lanes = orig_shape[-1]                        # pure reshape view, no copy
        rows = total // lanes
        pad = 0
    else:
        lanes = _LANES
        rows = -(-total // lanes)
        pad = rows * lanes - total                    # <= 1023 elements

    x2d = x.reshape(-1)
    if pad:
        # TODO(synk): the <1024-element tail pad still costs one flat copy; only
        # taken when the flattened size is not a multiple of 1024.
        x2d = jnp.pad(x2d, (0, pad))
    x2d = x2d.reshape(rows, lanes)

    block_rows = _choose_block_rows(rows, lanes, itemsize)
    grid = (-(-rows // block_rows),)                  # partial edge block masked by Pallas

    d = float(delta)
    # Reciprocal-multiply only when bit-exact (delta a power of two, e.g. default 1.0).
    use_recip = (d != 0.0) and (abs(math.frexp(d)[0]) == 0.5)
    kernel = functools.partial(
        _uaq_kernel,
        delta=d,
        inv_delta=(1.0 / d) if d != 0.0 else 0.0,
        use_recip=use_recip,
        zero_point=float(zero_point),
        qmax=float(n_levels - 1),
    )

    out2d = pl.pallas_call(
        kernel,
        out_shape=jax.ShapeDtypeStruct((rows, lanes), orig_dtype),
        grid=grid,
        in_specs=[pl.BlockSpec((block_rows, lanes), lambda i: (i, 0))],
        out_specs=pl.BlockSpec((block_rows, lanes), lambda i: (i, 0)),
        compiler_params=pltpu.CompilerParams(
            dimension_semantics=("parallel",),
            vmem_limit_bytes=32 * 1024 * 1024,
        ),
        cost_estimate=pl.CostEstimate(
            flops=5 * total,
            transcendentals=0,
            bytes_accessed=2 * total * itemsize,
        ),
    )(x2d)

    out_flat = out2d.reshape(-1)
    if pad:
        out_flat = out_flat[:total]
    return out_flat.reshape(orig_shape)


def _reference(x, delta=1.0, zero_point=0.0, n_bits=8):
    n_levels = 2 ** n_bits
    x_int = jnp.round(x / delta) + zero_point
    x_quant = jnp.clip(x_int, 0.0, n_levels - 1)
    return (x_quant - zero_point) * delta


if __name__ == "__main__":
    # Deterministic example input consistent with an activation tensor (NCHW).
    key = jax.random.PRNGKey(0)
    x = jax.random.normal(key, (2, 4, 16, 16), dtype=jnp.float32) * 3.0

    # Quantizer state as in the module __init__ (inited=True): delta=1.0, zp=0.0, 8-bit.
    # TODO(synk): the init_quantization_scale / MSE 2D-search calibration path
    # (inited=False) and the is_training/prob<1 stochastic mixing are host-side /
    # training-time behaviour and are not part of the steady-state forward; not ported.
    out = uniform_affine_quantize(x, delta=1.0, zero_point=0.0, n_bits=8)
    out = jax.block_until_ready(out)
    ref = _reference(x, 1.0, 0.0, 8)
    np.testing.assert_allclose(np.asarray(out), np.asarray(ref), rtol=0, atol=0)

    # Second small case exercising the zero-copy path (trailing dim multiple of 128).
    key2 = jax.random.PRNGKey(0)
    x2 = jax.random.normal(key2, (16, 256), dtype=jnp.float32) * 5.0
    out2 = jax.block_until_ready(uniform_affine_quantize(x2, 1.0, 0.0, 8))
    np.testing.assert_allclose(np.asarray(out2), np.asarray(_reference(x2, 1.0, 0.0, 8)),
                               rtol=0, atol=0)

    print("KERNEL_OK")
</pallas_src>

<mosaic_0001>
module attributes {stable_mosaic.version = 11 : i64} {
  func.func @_uaq_kernel(%arg0: i32, %arg1: memref<2x1024xf32, #tpu.memory_space<vmem>>, %arg2: memref<2x1024xf32, #tpu.memory_space<vmem>>) attributes {dimension_semantics = [#tpu.dimension_semantics<parallel>], iteration_bounds = array<i64: 1>, scalar_prefetch = 0 : i64, scratch_operands = 0 : i64, tpu.core_type = #tpu.core_type<tc>, window_params = [{transform_indices = @transform_0, window_bounds = array<i64: 2, 1024>}, {transform_indices = @transform_1, window_bounds = array<i64: 2, 1024>}]} {
    %c0 = arith.constant 0 : index
    %c0_0 = arith.constant 0 : index
    %0 = vector.load %arg1[%c0, %c0_0] : memref<2x1024xf32, #tpu.memory_space<vmem>>, vector<2x1024xf32>
    %cst = arith.constant 1.000000e+00 : f32
    %1 = vector.broadcast %cst : f32 to vector<2x1024xf32>
    %2 = arith.mulf %0, %1 : vector<2x1024xf32>
    %3 = math.roundeven %2 : vector<2x1024xf32>
    %cst_1 = arith.constant 0.000000e+00 : f32
    %4 = vector.broadcast %cst_1 : f32 to vector<2x1024xf32>
    %5 = arith.addf %3, %4 : vector<2x1024xf32>
    %cst_2 = arith.constant 0.000000e+00 : f32
    %cst_3 = arith.constant 2.550000e+02 : f32
    %6 = vector.broadcast %cst_2 : f32 to vector<2x1024xf32>
    %7 = arith.maximumf %6, %5 : vector<2x1024xf32>
    %8 = vector.broadcast %cst_3 : f32 to vector<2x1024xf32>
    %9 = arith.minimumf %8, %7 : vector<2x1024xf32>
    %cst_4 = arith.constant 0.000000e+00 : f32
    %10 = vector.broadcast %cst_4 : f32 to vector<2x1024xf32>
    %11 = arith.subf %9, %10 : vector<2x1024xf32>
    %cst_5 = arith.constant 1.000000e+00 : f32
    %12 = vector.broadcast %cst_5 : f32 to vector<2x1024xf32>
    %13 = arith.mulf %11, %12 : vector<2x1024xf32>
    %c0_6 = arith.constant 0 : index
    %c0_7 = arith.constant 0 : index
    %14 = vector.load %arg2[%c0_6, %c0_7] : memref<2x1024xf32, #tpu.memory_space<vmem>>, vector<2x1024xf32>
    tpu.vector_store %arg2[%c0_6, %c0_7], %13 {strides = array<i32>} : memref<2x1024xf32, #tpu.memory_space<vmem>>, vector<2x1024xf32>,
    return
  }
  func.func @transform_0(%arg0: i32) -> (i32, i32) {
    %c0_i32 = arith.constant 0 : i32
    %c0_i32_0 = arith.constant 0 : i32
    return %arg0, %c0_i32 : i32, i32
  }
  func.func @transform_1(%arg0: i32) -> (i32, i32) {
    %c0_i32 = arith.constant 0 : i32
    %c0_i32_0 = arith.constant 0 : i32
    return %arg0, %c0_i32 : i32, i32
  }
}

</mosaic_0001>

<bundles_post_ra>
// kernel: tpu_custom_call.1
= control target key start
LH: loop header
LB: loop body
LE: loop exit
PB: predicated region body
PF: predicated region fallthrough
CT: control target
= control target key end

     0   :  { %6 = vsyncpa [#allocation3], 0  ;;  %s136_s0 = inlined_call_operand.hbm [shape: f32[2,1024], index: 0, kind: input, shape index: {}]   ;;  %s137_s1 = inlined_call_operand.hbm [shape: f32[2,1024], index: 1, kind: output, shape index: {}]  }
   0x1   :  { %7 = vsyncpa [#allocation4], 0  ;;  %s100_s6 = smov [#allocation2]   ;;  %s52_s10 = scalar_lea.hbm %s136_s0, 256 }
   0x2   :  { %s14_s7 = sshll.u32 %s100_s6, 4  ;;  %p53_p0 = scmp.ne.s32.totalorder %s136_s0, %s52_s10  ;;  %s15_s7 = int_to_ptr.vmem [resolvable:$true] %s14_s7 }
   0x3   :  { %p56_p1 = scmp.lt.u32.totalorder %s52_s10, %s136_s0 }
   0x5   :  { %p58_p2 = pnand %p56_p1, %p53_p0 }
   0x7   :  { %61 = shalt.err (!%p58_p2)
}
   0x8   :  { %s62_s15 = scalar_lea.vmem %s15_s7, 256  ;;  %p67_p4 = scmp.lt.s32.totalorder %s15_s7, %s15_s7 }
   0x9   :  { %p63_p3 = scmp.ne.s32.totalorder %s15_s7, %s62_s15  ;;  %p68_p5 = scmp.lt.s32.totalorder %s62_s15, %s62_s15 }
   0xb   :  { %p69_p6 = por %p68_p5, %p67_p4 }
   0xd   :  { %p70_p7 = pnand %p69_p6, %p63_p3 }
   0xf   :  { %73 = shalt.err (!%p70_p7)
}
  0x10   :  { %17 = dma.hbm_to_vmem [thread:$0]  %s136_s0, 256, %s15_s7, [#allocation3]  }
  0x11   :  { %96 = dma.done.wait [#allocation3], 256  }
  0x12   :  { %97 = vsyncadd [#allocation3], 4294967040  ;;  %v21_v0 = vld [vmem:[#allocation2] sm:$0xff]  ;;  %v22_v1 = vld [vmem:[#allocation2 + $0x8] sm:$0xff]  ;;  %s101_s18 = smov [#allocation5]  }
  0x13   :  { %v48_v2 = vround.rtne.f32 %v21_v0  ;;  %v49_v3 = vround.rtne.f32 %v22_v1  ;;  %s39_s19 = sshll.u32 %s101_s18, 4  ;;  %s40_s19 = int_to_ptr.vmem [resolvable:$true] %s39_s19 }
  0x14   :  { %s74_s20 = scalar_lea.vmem %s40_s19, 256  ;;  %p79_p9 = scmp.lt.s32.totalorder %s40_s19, %s40_s19 }
  0x15   :  { %v27_v4 = vmax.f32 %v48_v2, 0.0  ;;  %v28_v5 = vmax.f32 %v49_v3, 0.0  ;;  %p75_p8 = scmp.ne.s32.totalorder %s40_s19, %s74_s20  ;;  %p80_p10 = scmp.lt.s32.totalorder %s74_s20, %s74_s20 }
  0x17   :  { %v29_v6 = vmin.f32 %v27_v4, 255.0  ;;  %v30_v7 = vmin.f32 %v28_v5, 255.0  ;;  %p81_p11 = por %p80_p10, %p79_p9 }
  0x19   :  { %31 = vst [vmem:[#allocation5] sm:$0xff] %v29_v6  ;;  %32 = vst [vmem:[#allocation5 + $0x8] sm:$0xff] %v30_v7  ;;  %p82_p12 = pnand %p81_p11, %p75_p8 }
  0x1b   :  { %85 = shalt.err (!%p82_p12)
}
  0x1c   :  { %s86_s22 = scalar_lea.hbm %s137_s1, 256 }
  0x1d   :  { %p87_p13 = scmp.ne.s32.totalorder %s137_s1, %s86_s22  ;;  %p90_p0 = scmp.lt.u32.totalorder %s86_s22, %s137_s1 }
  0x1f   :  { %p92_p1 = pnand %p90_p0, %p87_p13 }
  0x21   :  { %95 = shalt.err (!%p92_p1)
}
  0x22   :  { %42 = dma.vmem_to_hbm [thread:$0]  %s40_s19, 256, %s137_s1, [#allocation4]  }
  0x23   :  { %98 = dma.done.wait [#allocation4], 256  }
  0x24   :  { %99 = vsyncadd [#allocation4], 4294967040 }
  0x25   :  { %46 = vsyncpa [#allocation3], 1 }
  0x26   :  { %47 = vsyncpa [#allocation4], 1 }

</bundles_post_ra>
